<compile_context>
chip_gen: v6e
topology: v6e:2x2x1
jax: 0.10.0
libtpu: 0.0.40
codegen_flags: <defaults>
</compile_context>

<pallas_src>
import numpy as np
import jax
import jax.numpy as jnp
from jax import lax
from jax.experimental import pallas as pl
from jax.experimental.pallas import tpu as pltpu

# ------------------------------ problem sizes ------------------------------
B = 2
CIN = 8                   # must be >= 8 so that channel // 8 >= 1
COUT = 8
H = W = 16
HP, WP = H // 2, W // 2   # pooled spatial
S = HP * WP               # pooled pixels per batch
BS = B * S                # fused batch*spatial -> lane dimension (128)
D = CIN // 8              # PA/CA squeeze width

assert D == 1, "kernel specializes the PA/CA squeeze to channel // 8 == 1"
assert COUT == CIN, "conv bias is packed into the (CIN, 5) per-branch vector slab"
assert BS == 128, "layout assumes the fused batch*spatial extent fills 128 lanes"

_TAPS = tuple((t // 3 - 1, t % 3 - 1) for t in range(9))   # (dy, dx) for 3x3 conv


def _build_masks():
    """Constant (9 + B, CIN, BS) f32 slab.

    Rows 0..8 : validity mask of each 3x3 tap in the fused lane layout
                (pooled-image edges AND batch seams), so the conv im2col needs
                only a vreg multiply per tap inside the kernel.
    Rows 9..10: per-batch lane-membership masks for the CALayer global mean
                and its scatter back to lanes.
    """
    lane = np.arange(BS)
    sp = lane % S
    hh, ww = sp // WP, sp % WP
    rows = []
    for dy, dx in _TAPS:
        rows.append((hh + dy >= 0) & (hh + dy < HP) &
                    (ww + dx >= 0) & (ww + dx < WP))
    for b in range(B):
        rows.append((lane >= b * S) & (lane < (b + 1) * S))
    m = np.stack(rows).astype(np.float32)                        # (11, BS)
    m = np.broadcast_to(m[:, None, :], (len(rows), CIN, BS)).copy()
    return jnp.asarray(m)                                        # (11, CIN, BS)


_MASKS = _build_masks()


def _sigmoid(z):
    # Exact sigmoid: exp runs on the EUP; the lone divide on these tiny
    # (1,128) / (CIN,1) tensors is negligible.  pl.reciprocal(approx=True) was
    # evaluated but kept out to preserve the tight 2e-3 numerical check.
    return 1.0 / (1.0 + jnp.exp(-z))


def ytmt_down_kernel(x_ref, wconv_ref, vec_ref, mask_ref, scal_ref, out_ref):
    inv_s = 1.0 / S

    def _lane_shift(x, delta):
        # shifted[:, p] = x[:, p + delta]  (zeros past the array ends; interior
        # row/batch wraps are removed by the precomputed tap masks).  Pure
        # register lane-shift -> no VMEM padding scratch.
        # TODO(synk): pltpu.roll would push these shifts onto the XLU slot
        # explicitly; concatenate is kept because its semantics are verified
        # against the reference and the wrap direction is masked either way.
        if delta == 0:
            return x
        if delta > 0:
            return jnp.concatenate(
                [x[:, delta:], jnp.zeros((CIN, delta), jnp.float32)], axis=1)
        return jnp.concatenate(
            [jnp.zeros((CIN, -delta), jnp.float32), x[:, :delta]], axis=1)

    def branch(br):
        # ---- 2x2 max pool (window axis pre-arranged by the wrapper) ----
        x = jnp.maximum(jnp.maximum(x_ref[br, 0], x_ref[br, 1]),
                        jnp.maximum(x_ref[br, 2], x_ref[br, 3]))   # (CIN, BS)

        vecs = vec_ref[br]                                         # (CIN, 5)
        pa_w1, ca_w1 = vecs[:, 0:1], vecs[:, 1:2]
        ca_w2, ca_b2 = vecs[:, 2:3], vecs[:, 3:4]
        conv_b = vecs[:, 4:5]
        pa_b1 = scal_ref[4 * br + 0]
        pa_w2 = scal_ref[4 * br + 1]
        pa_b2 = scal_ref[4 * br + 2]
        ca_b1 = scal_ref[4 * br + 3]

        # ---- PALayer: per-pixel channel squeeze (sublane reduction) ----
        h = jnp.maximum(jnp.sum(x * pa_w1, axis=0, keepdims=True) + pa_b1, 0.0)
        x = x * _sigmoid(pa_w2 * h + pa_b2)                        # (CIN, BS)

        # ---- CALayer: per-batch global mean -> channel excitation ----
        ca_scale = None
        for b in range(B):
            bm = mask_ref[9 + b]                                   # (CIN, BS) 0/1
            m_b = jnp.sum(x * bm, axis=1, keepdims=True) * inv_s   # (CIN, 1)
            h_b = jnp.maximum(
                jnp.sum(m_b * ca_w1, axis=0, keepdims=True) + ca_b1, 0.0)
            y_b = _sigmoid(ca_w2 * h_b + ca_b2)                    # (CIN, 1)
            part = y_b * bm                                        # scatter to lanes
            ca_scale = part if ca_scale is None else ca_scale + part
        x = x * ca_scale

        # ---- im2col taps for the 3x3 conv: lane-shift + precomputed mask ----
        cols = [mask_ref[t] * _lane_shift(x, dy * WP + dx)
                for t, (dy, dx) in enumerate(_TAPS)]               # 9 x (CIN, BS)
        return cols, conv_b

    cols_l, bias_l = branch(0)
    cols_r, bias_r = branch(1)

    # Both branches' 3x3 convs in ONE block-diagonal MXU matmul:
    #   (2*COUT, 2*9*CIN) @ (2*9*CIN, B*S) = (16, 144) @ (144, 128)
    xcol = jnp.concatenate(cols_l + cols_r, axis=0)                # (144, BS)
    bias = jnp.concatenate([bias_l, bias_r], axis=0)               # (16, 1)
    conv = jnp.dot(wconv_ref[...], xcol,
                   preferred_element_type=jnp.float32) + bias      # (16, BS)

    # ---- AdditiveYTMTHead: out_l = relu(l) + (r - relu(r)); symmetric for r
    l, r = conv[:COUT], conv[COUT:]
    rl = jnp.maximum(l, 0.0)
    rr = jnp.maximum(r, 0.0)
    out_ref[...] = jnp.concatenate([rl + (r - rr), rr + (l - rl)], axis=0)


# --------------------------- wrapper (layout glue) ---------------------------

def _prep_input(x):
    """NCHW (B,C,H,W) -> (4, C, B*HP*WP): pool-window taps, channels on
    sublanes, flattened pooled spatial (batch-major) on lanes."""
    b, c, h, w = x.shape
    x = x.reshape(b, c, h // 2, 2, w // 2, 2)           # b c hp dy wp dx
    x = jnp.transpose(x, (3, 5, 1, 0, 2, 4))            # dy dx c b hp wp
    return x.reshape(4, c, b * (h // 2) * (w // 2))


def _pack_params(p_l, p_r):
    def vecs(p):
        return jnp.stack([p['pa_w1'].reshape(CIN),
                          p['ca_w1'].reshape(CIN),
                          p['ca_w2'].reshape(CIN),
                          p['ca_b2'].reshape(CIN),
                          p['conv_b'].reshape(CIN)], axis=-1)      # (CIN, 5)

    def wmat(p):
        # OIHW -> (O, ky, kx, C) -> (O, 9*C): tap-major / channel-minor rows,
        # matching the kernel's im2col row order.
        return jnp.transpose(p['conv_w'], (0, 2, 3, 1)).reshape(COUT, 9 * CIN)

    def scals(p):
        return jnp.concatenate([p['pa_b1'].reshape(1), p['pa_w2'].reshape(1),
                                p['pa_b2'].reshape(1), p['ca_b1'].reshape(1)])

    vec_params = jnp.stack([vecs(p_l), vecs(p_r)], axis=0).astype(jnp.float32)
    w_conv = jnp.zeros((2 * COUT, 2 * 9 * CIN), jnp.float32)
    w_conv = (w_conv.at[:COUT, :9 * CIN].set(wmat(p_l))
                     .at[COUT:, 9 * CIN:].set(wmat(p_r)))
    scalars = jnp.concatenate([scals(p_l), scals(p_r)]).astype(jnp.float32)
    return vec_params, w_conv, scalars


@jax.jit
def ytmt_down_block(xl, xr, p_l, p_r):
    x_all = jnp.stack([_prep_input(xl), _prep_input(xr)], axis=0)  # (2,4,CIN,BS)
    vec_params, w_conv, scalars = _pack_params(p_l, p_r)

    vmem = pltpu.MemorySpace.VMEM
    out = pl.pallas_call(
        ytmt_down_kernel,
        out_shape=jax.ShapeDtypeStruct((2 * COUT, BS), jnp.float32),
        in_specs=[pl.BlockSpec(memory_space=vmem),                  # activations
                  pl.BlockSpec(memory_space=vmem),                  # conv weights
                  pl.BlockSpec(memory_space=vmem),                  # channel vectors
                  pl.BlockSpec(memory_space=vmem),                  # constant masks
                  pl.BlockSpec(memory_space=pltpu.MemorySpace.SMEM)],  # scalars
        out_specs=pl.BlockSpec(memory_space=vmem),
    )(x_all, w_conv, vec_params, _MASKS, scalars)

    def to_nchw(o):  # (COUT, B*S) -> (B, COUT, HP, WP)
        return jnp.transpose(o.reshape(COUT, B, HP, WP), (1, 0, 2, 3))

    return to_nchw(out[:COUT]), to_nchw(out[COUT:])


# ------------------- deterministic parameter init -------------------

def init_params(key):
    def branch(k):
        ks = jax.random.split(k, 10)

        def n(kk, shape, s=0.2):
            return s * jax.random.normal(kk, shape, jnp.float32)

        return dict(
            pa_w1=n(ks[0], (D, CIN, 1, 1)), pa_b1=n(ks[1], (D,), 0.05),
            pa_w2=n(ks[2], (1, D, 1, 1)),   pa_b2=n(ks[3], (1,), 0.05),
            ca_w1=n(ks[4], (D, CIN, 1, 1)), ca_b1=n(ks[5], (D,), 0.05),
            ca_w2=n(ks[6], (CIN, D, 1, 1)), ca_b2=n(ks[7], (CIN,), 0.05),
            conv_w=n(ks[8], (COUT, CIN, 3, 3)), conv_b=n(ks[9], (COUT,), 0.05),
        )

    kl, kr = jax.random.split(key)
    return branch(kl), branch(kr)


# ---------------------- pure-JAX reference ----------------------

def _conv_ref(x, w, b, padding):
    out = lax.conv_general_dilated(
        x, w, window_strides=(1, 1), padding=[(padding, padding)] * 2,
        dimension_numbers=('NCHW', 'OIHW', 'NCHW'),
        precision=lax.Precision.HIGHEST)
    return out + b[None, :, None, None]


def _att_conv_block_ref(x, p):
    # PALayer
    y = jnp.maximum(_conv_ref(x, p['pa_w1'], p['pa_b1'], 0), 0.0)
    y = jax.nn.sigmoid(_conv_ref(y, p['pa_w2'], p['pa_b2'], 0))
    x = x * y
    # CALayer
    m = jnp.mean(x, axis=(2, 3), keepdims=True)
    m = jnp.maximum(_conv_ref(m, p['ca_w1'], p['ca_b1'], 0), 0.0)
    m = jax.nn.sigmoid(_conv_ref(m, p['ca_w2'], p['ca_b2'], 0))
    x = x * m
    # 3x3 conv
    return _conv_ref(x, p['conv_w'], p['conv_b'], 1)


def reference(xl, xr, p_l, p_r):
    def pool(x):
        return lax.reduce_window(x, -jnp.inf, lax.max,
                                 (1, 1, 2, 2), (1, 1, 2, 2), 'VALID')
    l = _att_conv_block_ref(pool(xl), p_l)
    r = _att_conv_block_ref(pool(xr), p_r)
    rl, rr = jnp.maximum(l, 0.0), jnp.maximum(r, 0.0)
    return rl + (r - rr), rr + (l - rl)


if __name__ == "__main__":
    key = jax.random.PRNGKey(0)
    kx1, kx2, kp = jax.random.split(key, 3)
    xl = jax.random.normal(kx1, (B, CIN, H, W), jnp.float32)
    xr = jax.random.normal(kx2, (B, CIN, H, W), jnp.float32)
    p_l, p_r = init_params(kp)

    out_l, out_r = ytmt_down_block(xl, xr, p_l, p_r)
    jax.block_until_ready((out_l, out_r))

    ref_l, ref_r = reference(xl, xr, p_l, p_r)
    assert out_l.shape == (B, COUT, HP, WP) and out_r.shape == (B, COUT, HP, WP)
    assert jnp.allclose(out_l, ref_l, atol=2e-3, rtol=2e-3), \
        float(jnp.max(jnp.abs(out_l - ref_l)))
    assert jnp.allclose(out_r, ref_r, atol=2e-3, rtol=2e-3), \
        float(jnp.max(jnp.abs(out_r - ref_r)))
    print("KERNEL_OK")
</pallas_src>

<mosaic_0001>
module attributes {stable_mosaic.version = 11 : i64} {
  func.func @ytmt_down_kernel(%arg0: memref<2x4x8x128xf32, #tpu.memory_space<vmem>>, %arg1: memref<16x144xf32, #tpu.memory_space<vmem>>, %arg2: memref<2x8x5xf32, #tpu.memory_space<vmem>>, %arg3: memref<11x8x128xf32, #tpu.memory_space<vmem>>, %arg4: memref<8xf32, #tpu.memory_space<smem>>, %arg5: memref<16x128xf32, #tpu.memory_space<vmem>>) attributes {dimension_semantics = [], scalar_prefetch = 0 : i64, scratch_operands = 0 : i64, tpu.core_type = #tpu.core_type<tc>} {
    %c0 = arith.constant 0 : index
    %c0_0 = arith.constant 0 : index
    %c0_1 = arith.constant 0 : index
    %c0_2 = arith.constant 0 : index
    %0 = vector.load %arg0[%c0, %c0_0, %c0_1, %c0_2] : memref<2x4x8x128xf32, #tpu.memory_space<vmem>>, vector<1x1x8x128xf32>
    %1 = vector.shape_cast %0 : vector<1x1x8x128xf32> to vector<8x128xf32>
    %c0_3 = arith.constant 0 : index
    %c1 = arith.constant 1 : index
    %c0_4 = arith.constant 0 : index
    %c0_5 = arith.constant 0 : index
    %2 = vector.load %arg0[%c0_3, %c1, %c0_4, %c0_5] : memref<2x4x8x128xf32, #tpu.memory_space<vmem>>, vector<1x1x8x128xf32>
    %3 = vector.shape_cast %2 : vector<1x1x8x128xf32> to vector<8x128xf32>
    %4 = arith.maximumf %1, %3 : vector<8x128xf32>
    %c0_6 = arith.constant 0 : index
    %c2 = arith.constant 2 : index
    %c0_7 = arith.constant 0 : index
    %c0_8 = arith.constant 0 : index
    %5 = vector.load %arg0[%c0_6, %c2, %c0_7, %c0_8] : memref<2x4x8x128xf32, #tpu.memory_space<vmem>>, vector<1x1x8x128xf32>
    %6 = vector.shape_cast %5 : vector<1x1x8x128xf32> to vector<8x128xf32>
    %c0_9 = arith.constant 0 : index
    %c3 = arith.constant 3 : index
    %c0_10 = arith.constant 0 : index
    %c0_11 = arith.constant 0 : index
    %7 = vector.load %arg0[%c0_9, %c3, %c0_10, %c0_11] : memref<2x4x8x128xf32, #tpu.memory_space<vmem>>, vector<1x1x8x128xf32>
    %8 = vector.shape_cast %7 : vector<1x1x8x128xf32> to vector<8x128xf32>
    %9 = arith.maximumf %6, %8 : vector<8x128xf32>
    %10 = arith.maximumf %4, %9 : vector<8x128xf32>
    %c0_12 = arith.constant 0 : index
    %c0_13 = arith.constant 0 : index
    %c0_14 = arith.constant 0 : index
    %11 = vector.load %arg2[%c0_12, %c0_13, %c0_14] : memref<2x8x5xf32, #tpu.memory_space<vmem>>, vector<1x8x5xf32>
    %12 = vector.shape_cast %11 : vector<1x8x5xf32> to vector<8x5xf32>
    %13 = vector.extract_strided_slice %12 {offsets = [0, 0], sizes = [8, 1], strides = [1, 1]} : vector<8x5xf32> to vector<8x1xf32>
    %14 = vector.extract_strided_slice %12 {offsets = [0, 1], sizes = [8, 1], strides = [1, 1]} : vector<8x5xf32> to vector<8x1xf32>
    %15 = vector.extract_strided_slice %12 {offsets = [0, 2], sizes = [8, 1], strides = [1, 1]} : vector<8x5xf32> to vector<8x1xf32>
    %16 = vector.extract_strided_slice %12 {offsets = [0, 3], sizes = [8, 1], strides = [1, 1]} : vector<8x5xf32> to vector<8x1xf32>
    %17 = vector.extract_strided_slice %12 {offsets = [0, 4], sizes = [8, 1], strides = [1, 1]} : vector<8x5xf32> to vector<8x1xf32>
    %c0_15 = arith.constant 0 : index
    %18 = memref.load %arg4[%c0_15] : memref<8xf32, #tpu.memory_space<smem>>
    %c1_16 = arith.constant 1 : index
    %19 = memref.load %arg4[%c1_16] : memref<8xf32, #tpu.memory_space<smem>>
    %c2_17 = arith.constant 2 : index
    %20 = memref.load %arg4[%c2_17] : memref<8xf32, #tpu.memory_space<smem>>
    %c3_18 = arith.constant 3 : index
    %21 = memref.load %arg4[%c3_18] : memref<8xf32, #tpu.memory_space<smem>>
    %22 = vector.broadcast %13 : vector<8x1xf32> to vector<8x128xf32>
    %23 = arith.mulf %10, %22 : vector<8x128xf32>
    %cst = arith.constant dense<0.000000e+00> : vector<128xf32>
    %24 = vector.multi_reduction <add>, %23, %cst [0] : vector<8x128xf32> to vector<128xf32>
    %25 = vector.shape_cast %24 : vector<128xf32> to vector<1x128xf32>
    %26 = vector.broadcast %18 : f32 to vector<1x128xf32>
    %27 = arith.addf %25, %26 : vector<1x128xf32>
    %cst_19 = arith.constant 0.000000e+00 : f32
    %28 = vector.broadcast %cst_19 : f32 to vector<1x128xf32>
    %29 = arith.maximumf %27, %28 : vector<1x128xf32>
    %30 = vector.broadcast %19 : f32 to vector<1x128xf32>
    %31 = arith.mulf %30, %29 : vector<1x128xf32>
    %32 = vector.broadcast %20 : f32 to vector<1x128xf32>
    %33 = arith.addf %31, %32 : vector<1x128xf32>
    %cst_20 = arith.constant 0.000000e+00 : f32
    %34 = vector.broadcast %cst_20 : f32 to vector<1x128xf32>
    %35 = arith.subf %34, %33 : vector<1x128xf32>
    %36 = math.exp %35 : vector<1x128xf32>
    %cst_21 = arith.constant 1.000000e+00 : f32
    %37 = vector.broadcast %cst_21 : f32 to vector<1x128xf32>
    %38 = arith.addf %37, %36 : vector<1x128xf32>
    %cst_22 = arith.constant 1.000000e+00 : f32
    %39 = vector.broadcast %cst_22 : f32 to vector<1x128xf32>
    %40 = arith.divf %39, %38 : vector<1x128xf32>
    %41 = vector.broadcast %40 : vector<1x128xf32> to vector<8x128xf32>
    %42 = arith.mulf %10, %41 : vector<8x128xf32>
    %c9 = arith.constant 9 : index
    %c0_23 = arith.constant 0 : index
    %c0_24 = arith.constant 0 : index
    %43 = vector.load %arg3[%c9, %c0_23, %c0_24] : memref<11x8x128xf32, #tpu.memory_space<vmem>>, vector<1x8x128xf32>
    %44 = vector.shape_cast %43 : vector<1x8x128xf32> to vector<8x128xf32>
    %45 = arith.mulf %42, %44 : vector<8x128xf32>
    %cst_25 = arith.constant dense<0.000000e+00> : vector<8xf32>
    %46 = vector.multi_reduction <add>, %45, %cst_25 [1] : vector<8x128xf32> to vector<8xf32>
    %47 = vector.shape_cast %46 : vector<8xf32> to vector<8x1xf32>
    %cst_26 = arith.constant 1.562500e-02 : f32
    %48 = vector.broadcast %cst_26 : f32 to vector<8x1xf32>
    %49 = arith.mulf %47, %48 : vector<8x1xf32>
    %50 = arith.mulf %49, %14 : vector<8x1xf32>
    %cst_27 = arith.constant dense<0.000000e+00> : vector<1xf32>
    %51 = vector.multi_reduction <add>, %50, %cst_27 [0] : vector<8x1xf32> to vector<1xf32>
    %52 = vector.shape_cast %51 : vector<1xf32> to vector<1x1xf32>
    %53 = vector.broadcast %21 : f32 to vector<1x1xf32>
    %54 = arith.addf %52, %53 : vector<1x1xf32>
    %cst_28 = arith.constant 0.000000e+00 : f32
    %55 = vector.broadcast %cst_28 : f32 to vector<1x1xf32>
    %56 = arith.maximumf %54, %55 : vector<1x1xf32>
    %57 = vector.broadcast %56 : vector<1x1xf32> to vector<8x1xf32>
    %58 = arith.mulf %15, %57 : vector<8x1xf32>
    %59 = arith.addf %58, %16 : vector<8x1xf32>
    %cst_29 = arith.constant 0.000000e+00 : f32
    %60 = vector.broadcast %cst_29 : f32 to vector<8x1xf32>
    %61 = arith.subf %60, %59 : vector<8x1xf32>
    %62 = math.exp %61 : vector<8x1xf32>
    %cst_30 = arith.constant 1.000000e+00 : f32
    %63 = vector.broadcast %cst_30 : f32 to vector<8x1xf32>
    %64 = arith.addf %63, %62 : vector<8x1xf32>
    %cst_31 = arith.constant 1.000000e+00 : f32
    %65 = vector.broadcast %cst_31 : f32 to vector<8x1xf32>
    %66 = arith.divf %65, %64 : vector<8x1xf32>
    %67 = vector.broadcast %66 : vector<8x1xf32> to vector<8x128xf32>
    %68 = arith.mulf %67, %44 : vector<8x128xf32>
    %c10 = arith.constant 10 : index
    %c0_32 = arith.constant 0 : index
    %c0_33 = arith.constant 0 : index
    %69 = vector.load %arg3[%c10, %c0_32, %c0_33] : memref<11x8x128xf32, #tpu.memory_space<vmem>>, vector<1x8x128xf32>
    %70 = vector.shape_cast %69 : vector<1x8x128xf32> to vector<8x128xf32>
    %71 = arith.mulf %42, %70 : vector<8x128xf32>
    %cst_34 = arith.constant dense<0.000000e+00> : vector<8xf32>
    %72 = vector.multi_reduction <add>, %71, %cst_34 [1] : vector<8x128xf32> to vector<8xf32>
    %73 = vector.shape_cast %72 : vector<8xf32> to vector<8x1xf32>
    %cst_35 = arith.constant 1.562500e-02 : f32
    %74 = vector.broadcast %cst_35 : f32 to vector<8x1xf32>
    %75 = arith.mulf %73, %74 : vector<8x1xf32>
    %76 = arith.mulf %75, %14 : vector<8x1xf32>
    %cst_36 = arith.constant dense<0.000000e+00> : vector<1xf32>
    %77 = vector.multi_reduction <add>, %76, %cst_36 [0] : vector<8x1xf32> to vector<1xf32>
    %78 = vector.shape_cast %77 : vector<1xf32> to vector<1x1xf32>
    %79 = vector.broadcast %21 : f32 to vector<1x1xf32>
    %80 = arith.addf %78, %79 : vector<1x1xf32>
    %cst_37 = arith.constant 0.000000e+00 : f32
    %81 = vector.broadcast %cst_37 : f32 to vector<1x1xf32>
    %82 = arith.maximumf %80, %81 : vector<1x1xf32>
    %83 = vector.broadcast %82 : vector<1x1xf32> to vector<8x1xf32>
    %84 = arith.mulf %15, %83 : vector<8x1xf32>
    %85 = arith.addf %84, %16 : vector<8x1xf32>
    %cst_38 = arith.constant 0.000000e+00 : f32
    %86 = vector.broadcast %cst_38 : f32 to vector<8x1xf32>
    %87 = arith.subf %86, %85 : vector<8x1xf32>
    %88 = math.exp %87 : vector<8x1xf32>
    %cst_39 = arith.constant 1.000000e+00 : f32
    %89 = vector.broadcast %cst_39 : f32 to vector<8x1xf32>
    %90 = arith.addf %89, %88 : vector<8x1xf32>
    %cst_40 = arith.constant 1.000000e+00 : f32
    %91 = vector.broadcast %cst_40 : f32 to vector<8x1xf32>
    %92 = arith.divf %91, %90 : vector<8x1xf32>
    %93 = vector.broadcast %92 : vector<8x1xf32> to vector<8x128xf32>
    %94 = arith.mulf %93, %70 : vector<8x128xf32>
    %95 = arith.addf %68, %94 : vector<8x128xf32>
    %96 = arith.mulf %42, %95 : vector<8x128xf32>
    %c0_41 = arith.constant 0 : index
    %c0_42 = arith.constant 0 : index
    %c0_43 = arith.constant 0 : index
    %97 = vector.load %arg3[%c0_41, %c0_42, %c0_43] : memref<11x8x128xf32, #tpu.memory_space<vmem>>, vector<1x8x128xf32>
    %98 = vector.shape_cast %97 : vector<1x8x128xf32> to vector<8x128xf32>
    %cst_44 = arith.constant 0.000000e+00 : f32
    %99 = vector.broadcast %cst_44 : f32 to vector<8x9xf32>
    %100 = vector.extract_strided_slice %96 {offsets = [0, 0], sizes = [8, 119], strides = [1, 1]} : vector<8x128xf32> to vector<8x119xf32>
    %101 = tpu.concatenate %99, %100 in 1 : vector<8x9xf32>, vector<8x119xf32> -> vector<8x128xf32>
    %102 = arith.mulf %98, %101 : vector<8x128xf32>
    %c1_45 = arith.constant 1 : index
    %c0_46 = arith.constant 0 : index
    %c0_47 = arith.constant 0 : index
    %103 = vector.load %arg3[%c1_45, %c0_46, %c0_47] : memref<11x8x128xf32, #tpu.memory_space<vmem>>, vector<1x8x128xf32>
    %104 = vector.shape_cast %103 : vector<1x8x128xf32> to vector<8x128xf32>
    %cst_48 = arith.constant 0.000000e+00 : f32
    %105 = vector.broadcast %cst_48 : f32 to vector<8x8xf32>
    %106 = vector.extract_strided_slice %96 {offsets = [0, 0], sizes = [8, 120], strides = [1, 1]} : vector<8x128xf32> to vector<8x120xf32>
    %107 = tpu.concatenate %105, %106 in 1 : vector<8x8xf32>, vector<8x120xf32> -> vector<8x128xf32>
    %108 = arith.mulf %104, %107 : vector<8x128xf32>
    %c2_49 = arith.constant 2 : index
    %c0_50 = arith.constant 0 : index
    %c0_51 = arith.constant 0 : index
    %109 = vector.load %arg3[%c2_49, %c0_50, %c0_51] : memref<11x8x128xf32, #tpu.memory_space<vmem>>, vector<1x8x128xf32>
    %110 = vector.shape_cast %109 : vector<1x8x128xf32> to vector<8x128xf32>
    %cst_52 = arith.constant 0.000000e+00 : f32
    %111 = vector.broadcast %cst_52 : f32 to vector<8x7xf32>
    %112 = vector.extract_strided_slice %96 {offsets = [0, 0], sizes = [8, 121], strides = [1, 1]} : vector<8x128xf32> to vector<8x121xf32>
    %113 = tpu.concatenate %111, %112 in 1 : vector<8x7xf32>, vector<8x121xf32> -> vector<8x128xf32>
    %114 = arith.mulf %110, %113 : vector<8x128xf32>
    %c3_53 = arith.constant 3 : index
    %c0_54 = arith.constant 0 : index
    %c0_55 = arith.constant 0 : index
    %115 = vector.load %arg3[%c3_53, %c0_54, %c0_55] : memref<11x8x128xf32, #tpu.memory_space<vmem>>, vector<1x8x128xf32>
    %116 = vector.shape_cast %115 : vector<1x8x128xf32> to vector<8x128xf32>
    %cst_56 = arith.constant 0.000000e+00 : f32
    %117 = vector.broadcast %cst_56 : f32 to vector<8x1xf32>
    %118 = vector.extract_strided_slice %96 {offsets = [0, 0], sizes = [8, 127], strides = [1, 1]} : vector<8x128xf32> to vector<8x127xf32>
    %119 = tpu.concatenate %117, %118 in 1 : vector<8x1xf32>, vector<8x127xf32> -> vector<8x128xf32>
    %120 = arith.mulf %116, %119 : vector<8x128xf32>
    %c4 = arith.constant 4 : index
    %c0_57 = arith.constant 0 : index
    %c0_58 = arith.constant 0 : index
    %121 = vector.load %arg3[%c4, %c0_57, %c0_58] : memref<11x8x128xf32, #tpu.memory_space<vmem>>, vector<1x8x128xf32>
    %122 = vector.shape_cast %121 : vector<1x8x128xf32> to vector<8x128xf32>
    %123 = arith.mulf %122, %96 : vector<8x128xf32>
    %c5 = arith.constant 5 : index
    %c0_59 = arith.constant 0 : index
    %c0_60 = arith.constant 0 : index
    %124 = vector.load %arg3[%c5, %c0_59, %c0_60] : memref<11x8x128xf32, #tpu.memory_space<vmem>>, vector<1x8x128xf32>
    %125 = vector.shape_cast %124 : vector<1x8x128xf32> to vector<8x128xf32>
    %126 = vector.extract_strided_slice %96 {offsets = [0, 1], sizes = [8, 127], strides = [1, 1]} : vector<8x128xf32> to vector<8x127xf32>
    %cst_61 = arith.constant 0.000000e+00 : f32
    %127 = vector.broadcast %cst_61 : f32 to vector<8x1xf32>
    %128 = tpu.concatenate %126, %127 in 1 : vector<8x127xf32>, vector<8x1xf32> -> vector<8x128xf32>
    %129 = arith.mulf %125, %128 : vector<8x128xf32>
    %c6 = arith.constant 6 : index
    %c0_62 = arith.constant 0 : index
    %c0_63 = arith.constant 0 : index
    %130 = vector.load %arg3[%c6, %c0_62, %c0_63] : memref<11x8x128xf32, #tpu.memory_space<vmem>>, vector<1x8x128xf32>
    %131 = vector.shape_cast %130 : vector<1x8x128xf32> to vector<8x128xf32>
    %132 = vector.extract_strided_slice %96 {offsets = [0, 7], sizes = [8, 121], strides = [1, 1]} : vector<8x128xf32> to vector<8x121xf32>
    %cst_64 = arith.constant 0.000000e+00 : f32
    %133 = vector.broadcast %cst_64 : f32 to vector<8x7xf32>
    %134 = tpu.concatenate %132, %133 in 1 : vector<8x121xf32>, vector<8x7xf32> -> vector<8x128xf32>
    %135 = arith.mulf %131, %134 : vector<8x128xf32>
    %c7 = arith.constant 7 : index
    %c0_65 = arith.constant 0 : index
    %c0_66 = arith.constant 0 : index
    %136 = vector.load %arg3[%c7, %c0_65, %c0_66] : memref<11x8x128xf32, #tpu.memory_space<vmem>>, vector<1x8x128xf32>
    %137 = vector.shape_cast %136 : vector<1x8x128xf32> to vector<8x128xf32>
    %138 = vector.extract_strided_slice %96 {offsets = [0, 8], sizes = [8, 120], strides = [1, 1]} : vector<8x128xf32> to vector<8x120xf32>
    %cst_67 = arith.constant 0.000000e+00 : f32
    %139 = vector.broadcast %cst_67 : f32 to vector<8x8xf32>
    %140 = tpu.concatenate %138, %139 in 1 : vector<8x120xf32>, vector<8x8xf32> -> vector<8x128xf32>
    %141 = arith.mulf %137, %140 : vector<8x128xf32>
    %c8 = arith.constant 8 : index
    %c0_68 = arith.constant 0 : index
    %c0_69 = arith.constant 0 : index
    %142 = vector.load %arg3[%c8, %c0_68, %c0_69] : memref<11x8x128xf32, #tpu.memory_space<vmem>>, vector<1x8x128xf32>
    %143 = vector.shape_cast %142 : vector<1x8x128xf32> to vector<8x128xf32>
    %144 = vector.extract_strided_slice %96 {offsets = [0, 9], sizes = [8, 119], strides = [1, 1]} : vector<8x128xf32> to vector<8x119xf32>
    %cst_70 = arith.constant 0.000000e+00 : f32
    %145 = vector.broadcast %cst_70 : f32 to vector<8x9xf32>
    %146 = tpu.concatenate %144, %145 in 1 : vector<8x119xf32>, vector<8x9xf32> -> vector<8x128xf32>
    %147 = arith.mulf %143, %146 : vector<8x128xf32>
    %c1_71 = arith.constant 1 : index
    %c0_72 = arith.constant 0 : index
    %c0_73 = arith.constant 0 : index
    %c0_74 = arith.constant 0 : index
    %148 = vector.load %arg0[%c1_71, %c0_72, %c0_73, %c0_74] : memref<2x4x8x128xf32, #tpu.memory_space<vmem>>, vector<1x1x8x128xf32>
    %149 = vector.shape_cast %148 : vector<1x1x8x128xf32> to vector<8x128xf32>
    %c1_75 = arith.constant 1 : index
    %c1_76 = arith.constant 1 : index
    %c0_77 = arith.constant 0 : index
    %c0_78 = arith.constant 0 : index
    %150 = vector.load %arg0[%c1_75, %c1_76, %c0_77, %c0_78] : memref<2x4x8x128xf32, #tpu.memory_space<vmem>>, vector<1x1x8x128xf32>
    %151 = vector.shape_cast %150 : vector<1x1x8x128xf32> to vector<8x128xf32>
    %152 = arith.maximumf %149, %151 : vector<8x128xf32>
    %c1_79 = arith.constant 1 : index
    %c2_80 = arith.constant 2 : index
    %c0_81 = arith.constant 0 : index
    %c0_82 = arith.constant 0 : index
    %153 = vector.load %arg0[%c1_79, %c2_80, %c0_81, %c0_82] : memref<2x4x8x128xf32, #tpu.memory_space<vmem>>, vector<1x1x8x128xf32>
    %154 = vector.shape_cast %153 : vector<1x1x8x128xf32> to vector<8x128xf32>
    %c1_83 = arith.constant 1 : index
    %c3_84 = arith.constant 3 : index
    %c0_85 = arith.constant 0 : index
    %c0_86 = arith.constant 0 : index
    %155 = vector.load %arg0[%c1_83, %c3_84, %c0_85, %c0_86] : memref<2x4x8x128xf32, #tpu.memory_space<vmem>>, vector<1x1x8x128xf32>
    %156 = vector.shape_cast %155 : vector<1x1x8x128xf32> to vector<8x128xf32>
    %157 = arith.maximumf %154, %156 : vector<8x128xf32>
    %158 = arith.maximumf %152, %157 : vector<8x128xf32>
    %c1_87 = arith.constant 1 : index
    %c0_88 = arith.constant 0 : index
    %c0_89 = arith.constant 0 : index
    %159 = vector.load %arg2[%c1_87, %c0_88, %c0_89] : memref<2x8x5xf32, #tpu.memory_space<vmem>>, vector<1x8x5xf32>
    %160 = vector.shape_cast %159 : vector<1x8x5xf32> to vector<8x5xf32>
    %161 = vector.extract_strided_slice %160 {offsets = [0, 0], sizes = [8, 1], strides = [1, 1]} : vector<8x5xf32> to vector<8x1xf32>
    %162 = vector.extract_strided_slice %160 {offsets = [0, 1], sizes = [8, 1], strides = [1, 1]} : vector<8x5xf32> to vector<8x1xf32>
    %163 = vector.extract_strided_slice %160 {offsets = [0, 2], sizes = [8, 1], strides = [1, 1]} : vector<8x5xf32> to vector<8x1xf32>
    %164 = vector.extract_strided_slice %160 {offsets = [0, 3], sizes = [8, 1], strides = [1, 1]} : vector<8x5xf32> to vector<8x1xf32>
    %165 = vector.extract_strided_slice %160 {offsets = [0, 4], sizes = [8, 1], strides = [1, 1]} : vector<8x5xf32> to vector<8x1xf32>
    %c4_90 = arith.constant 4 : index
    %166 = memref.load %arg4[%c4_90] : memref<8xf32, #tpu.memory_space<smem>>
    %c5_91 = arith.constant 5 : index
    %167 = memref.load %arg4[%c5_91] : memref<8xf32, #tpu.memory_space<smem>>
    %c6_92 = arith.constant 6 : index
    %168 = memref.load %arg4[%c6_92] : memref<8xf32, #tpu.memory_space<smem>>
    %c7_93 = arith.constant 7 : index
    %169 = memref.load %arg4[%c7_93] : memref<8xf32, #tpu.memory_space<smem>>
    %170 = vector.broadcast %161 : vector<8x1xf32> to vector<8x128xf32>
    %171 = arith.mulf %158, %170 : vector<8x128xf32>
    %cst_94 = arith.constant dense<0.000000e+00> : vector<128xf32>
    %172 = vector.multi_reduction <add>, %171, %cst_94 [0] : vector<8x128xf32> to vector<128xf32>
    %173 = vector.shape_cast %172 : vector<128xf32> to vector<1x128xf32>
    %174 = vector.broadcast %166 : f32 to vector<1x128xf32>
    %175 = arith.addf %173, %174 : vector<1x128xf32>
    %cst_95 = arith.constant 0.000000e+00 : f32
    %176 = vector.broadcast %cst_95 : f32 to vector<1x128xf32>
    %177 = arith.maximumf %175, %176 : vector<1x128xf32>
    %178 = vector.broadcast %167 : f32 to vector<1x128xf32>
    %179 = arith.mulf %178, %177 : vector<1x128xf32>
    %180 = vector.broadcast %168 : f32 to vector<1x128xf32>
    %181 = arith.addf %179, %180 : vector<1x128xf32>
    %cst_96 = arith.constant 0.000000e+00 : f32
    %182 = vector.broadcast %cst_96 : f32 to vector<1x128xf32>
    %183 = arith.subf %182, %181 : vector<1x128xf32>
    %184 = math.exp %183 : vector<1x128xf32>
    %cst_97 = arith.constant 1.000000e+00 : f32
    %185 = vector.broadcast %cst_97 : f32 to vector<1x128xf32>
    %186 = arith.addf %185, %184 : vector<1x128xf32>
    %cst_98 = arith.constant 1.000000e+00 : f32
    %187 = vector.broadcast %cst_98 : f32 to vector<1x128xf32>
    %188 = arith.divf %187, %186 : vector<1x128xf32>
    %189 = vector.broadcast %188 : vector<1x128xf32> to vector<8x128xf32>
    %190 = arith.mulf %158, %189 : vector<8x128xf32>
    %c9_99 = arith.constant 9 : index
    %c0_100 = arith.constant 0 : index
    %c0_101 = arith.constant 0 : index
    %191 = vector.load %arg3[%c9_99, %c0_100, %c0_101] : memref<11x8x128xf32, #tpu.memory_space<vmem>>, vector<1x8x128xf32>
    %192 = vector.shape_cast %191 : vector<1x8x128xf32> to vector<8x128xf32>
    %193 = arith.mulf %190, %192 : vector<8x128xf32>
    %cst_102 = arith.constant dense<0.000000e+00> : vector<8xf32>
    %194 = vector.multi_reduction <add>, %193, %cst_102 [1] : vector<8x128xf32> to vector<8xf32>
    %195 = vector.shape_cast %194 : vector<8xf32> to vector<8x1xf32>
    %cst_103 = arith.constant 1.562500e-02 : f32
    %196 = vector.broadcast %cst_103 : f32 to vector<8x1xf32>
    %197 = arith.mulf %195, %196 : vector<8x1xf32>
    %198 = arith.mulf %197, %162 : vector<8x1xf32>
    %cst_104 = arith.constant dense<0.000000e+00> : vector<1xf32>
    %199 = vector.multi_reduction <add>, %198, %cst_104 [0] : vector<8x1xf32> to vector<1xf32>
    %200 = vector.shape_cast %199 : vector<1xf32> to vector<1x1xf32>
    %201 = vector.broadcast %169 : f32 to vector<1x1xf32>
    %202 = arith.addf %200, %201 : vector<1x1xf32>
    %cst_105 = arith.constant 0.000000e+00 : f32
    %203 = vector.broadcast %cst_105 : f32 to vector<1x1xf32>
    %204 = arith.maximumf %202, %203 : vector<1x1xf32>
    %205 = vector.broadcast %204 : vector<1x1xf32> to vector<8x1xf32>
    %206 = arith.mulf %163, %205 : vector<8x1xf32>
    %207 = arith.addf %206, %164 : vector<8x1xf32>
    %cst_106 = arith.constant 0.000000e+00 : f32
    %208 = vector.broadcast %cst_106 : f32 to vector<8x1xf32>
    %209 = arith.subf %208, %207 : vector<8x1xf32>
    %210 = math.exp %209 : vector<8x1xf32>
    %cst_107 = arith.constant 1.000000e+00 : f32
    %211 = vector.broadcast %cst_107 : f32 to vector<8x1xf32>
    %212 = arith.addf %211, %210 : vector<8x1xf32>
    %cst_108 = arith.constant 1.000000e+00 : f32
    %213 = vector.broadcast %cst_108 : f32 to vector<8x1xf32>
    %214 = arith.divf %213, %212 : vector<8x1xf32>
    %215 = vector.broadcast %214 : vector<8x1xf32> to vector<8x128xf32>
    %216 = arith.mulf %215, %192 : vector<8x128xf32>
    %c10_109 = arith.constant 10 : index
    %c0_110 = arith.constant 0 : index
    %c0_111 = arith.constant 0 : index
    %217 = vector.load %arg3[%c10_109, %c0_110, %c0_111] : memref<11x8x128xf32, #tpu.memory_space<vmem>>, vector<1x8x128xf32>
    %218 = vector.shape_cast %217 : vector<1x8x128xf32> to vector<8x128xf32>
    %219 = arith.mulf %190, %218 : vector<8x128xf32>
    %cst_112 = arith.constant dense<0.000000e+00> : vector<8xf32>
    %220 = vector.multi_reduction <add>, %219, %cst_112 [1] : vector<8x128xf32> to vector<8xf32>
    %221 = vector.shape_cast %220 : vector<8xf32> to vector<8x1xf32>
    %cst_113 = arith.constant 1.562500e-02 : f32
    %222 = vector.broadcast %cst_113 : f32 to vector<8x1xf32>
    %223 = arith.mulf %221, %222 : vector<8x1xf32>
    %224 = arith.mulf %223, %162 : vector<8x1xf32>
    %cst_114 = arith.constant dense<0.000000e+00> : vector<1xf32>
    %225 = vector.multi_reduction <add>, %224, %cst_114 [0] : vector<8x1xf32> to vector<1xf32>
    %226 = vector.shape_cast %225 : vector<1xf32> to vector<1x1xf32>
    %227 = vector.broadcast %169 : f32 to vector<1x1xf32>
    %228 = arith.addf %226, %227 : vector<1x1xf32>
    %cst_115 = arith.constant 0.000000e+00 : f32
    %229 = vector.broadcast %cst_115 : f32 to vector<1x1xf32>
    %230 = arith.maximumf %228, %229 : vector<1x1xf32>
    %231 = vector.broadcast %230 : vector<1x1xf32> to vector<8x1xf32>
    %232 = arith.mulf %163, %231 : vector<8x1xf32>
    %233 = arith.addf %232, %164 : vector<8x1xf32>
    %cst_116 = arith.constant 0.000000e+00 : f32
    %234 = vector.broadcast %cst_116 : f32 to vector<8x1xf32>
    %235 = arith.subf %234, %233 : vector<8x1xf32>
    %236 = math.exp %235 : vector<8x1xf32>
    %cst_117 = arith.constant 1.000000e+00 : f32
    %237 = vector.broadcast %cst_117 : f32 to vector<8x1xf32>
    %238 = arith.addf %237, %236 : vector<8x1xf32>
    %cst_118 = arith.constant 1.000000e+00 : f32
    %239 = vector.broadcast %cst_118 : f32 to vector<8x1xf32>
    %240 = arith.divf %239, %238 : vector<8x1xf32>
    %241 = vector.broadcast %240 : vector<8x1xf32> to vector<8x128xf32>
    %242 = arith.mulf %241, %218 : vector<8x128xf32>
    %243 = arith.addf %216, %242 : vector<8x128xf32>
    %244 = arith.mulf %190, %243 : vector<8x128xf32>
    %c0_119 = arith.constant 0 : index
    %c0_120 = arith.constant 0 : index
    %c0_121 = arith.constant 0 : index
    %245 = vector.load %arg3[%c0_119, %c0_120, %c0_121] : memref<11x8x128xf32, #tpu.memory_space<vmem>>, vector<1x8x128xf32>
    %246 = vector.shape_cast %245 : vector<1x8x128xf32> to vector<8x128xf32>
    %cst_122 = arith.constant 0.000000e+00 : f32
    %247 = vector.broadcast %cst_122 : f32 to vector<8x9xf32>
    %248 = vector.extract_strided_slice %244 {offsets = [0, 0], sizes = [8, 119], strides = [1, 1]} : vector<8x128xf32> to vector<8x119xf32>
    %249 = tpu.concatenate %247, %248 in 1 : vector<8x9xf32>, vector<8x119xf32> -> vector<8x128xf32>
    %250 = arith.mulf %246, %249 : vector<8x128xf32>
    %c1_123 = arith.constant 1 : index
    %c0_124 = arith.constant 0 : index
    %c0_125 = arith.constant 0 : index
    %251 = vector.load %arg3[%c1_123, %c0_124, %c0_125] : memref<11x8x128xf32, #tpu.memory_space<vmem>>, vector<1x8x128xf32>
    %252 = vector.shape_cast %251 : vector<1x8x128xf32> to vector<8x128xf32>
    %cst_126 = arith.constant 0.000000e+00 : f32
    %253 = vector.broadcast %cst_126 : f32 to vector<8x8xf32>
    %254 = vector.extract_strided_slice %244 {offsets = [0, 0], sizes = [8, 120], strides = [1, 1]} : vector<8x128xf32> to vector<8x120xf32>
    %255 = tpu.concatenate %253, %254 in 1 : vector<8x8xf32>, vector<8x120xf32> -> vector<8x128xf32>
    %256 = arith.mulf %252, %255 : vector<8x128xf32>
    %c2_127 = arith.constant 2 : index
    %c0_128 = arith.constant 0 : index
    %c0_129 = arith.constant 0 : index
    %257 = vector.load %arg3[%c2_127, %c0_128, %c0_129] : memref<11x8x128xf32, #tpu.memory_space<vmem>>, vector<1x8x128xf32>
    %258 = vector.shape_cast %257 : vector<1x8x128xf32> to vector<8x128xf32>
    %cst_130 = arith.constant 0.000000e+00 : f32
    %259 = vector.broadcast %cst_130 : f32 to vector<8x7xf32>
    %260 = vector.extract_strided_slice %244 {offsets = [0, 0], sizes = [8, 121], strides = [1, 1]} : vector<8x128xf32> to vector<8x121xf32>
    %261 = tpu.concatenate %259, %260 in 1 : vector<8x7xf32>, vector<8x121xf32> -> vector<8x128xf32>
    %262 = arith.mulf %258, %261 : vector<8x128xf32>
    %c3_131 = arith.constant 3 : index
    %c0_132 = arith.constant 0 : index
    %c0_133 = arith.constant 0 : index
    %263 = vector.load %arg3[%c3_131, %c0_132, %c0_133] : memref<11x8x128xf32, #tpu.memory_space<vmem>>, vector<1x8x128xf32>
    %264 = vector.shape_cast %263 : vector<1x8x128xf32> to vector<8x128xf32>
    %cst_134 = arith.constant 0.000000e+00 : f32
    %265 = vector.broadcast %cst_134 : f32 to vector<8x1xf32>
    %266 = vector.extract_strided_slice %244 {offsets = [0, 0], sizes = [8, 127], strides = [1, 1]} : vector<8x128xf32> to vector<8x127xf32>
    %267 = tpu.concatenate %265, %266 in 1 : vector<8x1xf32>, vector<8x127xf32> -> vector<8x128xf32>
    %268 = arith.mulf %264, %267 : vector<8x128xf32>
    %c4_135 = arith.constant 4 : index
    %c0_136 = arith.constant 0 : index
    %c0_137 = arith.constant 0 : index
    %269 = vector.load %arg3[%c4_135, %c0_136, %c0_137] : memref<11x8x128xf32, #tpu.memory_space<vmem>>, vector<1x8x128xf32>
    %270 = vector.shape_cast %269 : vector<1x8x128xf32> to vector<8x128xf32>
    %271 = arith.mulf %270, %244 : vector<8x128xf32>
    %c5_138 = arith.constant 5 : index
    %c0_139 = arith.constant 0 : index
    %c0_140 = arith.constant 0 : index
    %272 = vector.load %arg3[%c5_138, %c0_139, %c0_140] : memref<11x8x128xf32, #tpu.memory_space<vmem>>, vector<1x8x128xf32>
    %273 = vector.shape_cast %272 : vector<1x8x128xf32> to vector<8x128xf32>
    %274 = vector.extract_strided_slice %244 {offsets = [0, 1], sizes = [8, 127], strides = [1, 1]} : vector<8x128xf32> to vector<8x127xf32>
    %cst_141 = arith.constant 0.000000e+00 : f32
    %275 = vector.broadcast %cst_141 : f32 to vector<8x1xf32>
    %276 = tpu.concatenate %274, %275 in 1 : vector<8x127xf32>, vector<8x1xf32> -> vector<8x128xf32>
    %277 = arith.mulf %273, %276 : vector<8x128xf32>
    %c6_142 = arith.constant 6 : index
    %c0_143 = arith.constant 0 : index
    %c0_144 = arith.constant 0 : index
    %278 = vector.load %arg3[%c6_142, %c0_143, %c0_144] : memref<11x8x128xf32, #tpu.memory_space<vmem>>, vector<1x8x128xf32>
    %279 = vector.shape_cast %278 : vector<1x8x128xf32> to vector<8x128xf32>
    %280 = vector.extract_strided_slice %244 {offsets = [0, 7], sizes = [8, 121], strides = [1, 1]} : vector<8x128xf32> to vector<8x121xf32>
    %cst_145 = arith.constant 0.000000e+00 : f32
    %281 = vector.broadcast %cst_145 : f32 to vector<8x7xf32>
    %282 = tpu.concatenate %280, %281 in 1 : vector<8x121xf32>, vector<8x7xf32> -> vector<8x128xf32>
    %283 = arith.mulf %279, %282 : vector<8x128xf32>
    %c7_146 = arith.constant 7 : index
    %c0_147 = arith.constant 0 : index
    %c0_148 = arith.constant 0 : index
    %284 = vector.load %arg3[%c7_146, %c0_147, %c0_148] : memref<11x8x128xf32, #tpu.memory_space<vmem>>, vector<1x8x128xf32>
    %285 = vector.shape_cast %284 : vector<1x8x128xf32> to vector<8x128xf32>
    %286 = vector.extract_strided_slice %244 {offsets = [0, 8], sizes = [8, 120], strides = [1, 1]} : vector<8x128xf32> to vector<8x120xf32>
    %cst_149 = arith.constant 0.000000e+00 : f32
    %287 = vector.broadcast %cst_149 : f32 to vector<8x8xf32>
    %288 = tpu.concatenate %286, %287 in 1 : vector<8x120xf32>, vector<8x8xf32> -> vector<8x128xf32>
    %289 = arith.mulf %285, %288 : vector<8x128xf32>
    %c8_150 = arith.constant 8 : index
    %c0_151 = arith.constant 0 : index
    %c0_152 = arith.constant 0 : index
    %290 = vector.load %arg3[%c8_150, %c0_151, %c0_152] : memref<11x8x128xf32, #tpu.memory_space<vmem>>, vector<1x8x128xf32>
    %291 = vector.shape_cast %290 : vector<1x8x128xf32> to vector<8x128xf32>
    %292 = vector.extract_strided_slice %244 {offsets = [0, 9], sizes = [8, 119], strides = [1, 1]} : vector<8x128xf32> to vector<8x119xf32>
    %cst_153 = arith.constant 0.000000e+00 : f32
    %293 = vector.broadcast %cst_153 : f32 to vector<8x9xf32>
    %294 = tpu.concatenate %292, %293 in 1 : vector<8x119xf32>, vector<8x9xf32> -> vector<8x128xf32>
    %295 = arith.mulf %291, %294 : vector<8x128xf32>
    %296 = tpu.concatenate %102, %108, %114, %120, %123, %129, %135, %141, %147, %250, %256, %262, %268, %271, %277, %283 in 0 : vector<8x128xf32>, vector<8x128xf32>, vector<8x128xf32>, vector<8x128xf32>, vector<8x128xf32>, vector<8x128xf32>, vector<8x128xf32>, vector<8x128xf32>, vector<8x128xf32>, vector<8x128xf32>, vector<8x128xf32>, vector<8x128xf32>, vector<8x128xf32>, vector<8x128xf32>, vector<8x128xf32>, vector<8x128xf32> -> vector<128x128xf32>
    %297 = tpu.concatenate %289, %295 in 0 : vector<8x128xf32>, vector<8x128xf32> -> vector<16x128xf32>
    %298 = tpu.concatenate %296, %297 in 0 : vector<128x128xf32>, vector<16x128xf32> -> vector<144x128xf32>
    %299 = tpu.concatenate %17, %165 in 0 : vector<8x1xf32>, vector<8x1xf32> -> vector<16x1xf32>
    %c0_154 = arith.constant 0 : index
    %c0_155 = arith.constant 0 : index
    %300 = vector.load %arg1[%c0_154, %c0_155] : memref<16x144xf32, #tpu.memory_space<vmem>>, vector<16x144xf32>
    %cst_156 = arith.constant dense<0.000000e+00> : vector<16x128xf32>
    %301 = tpu.matmul %300, %298, %cst_156 {dimension_numbers = #tpu.dot_dimension_numbers<[1], [0], [0], [1], [0, 0, 1, 1], [], []>} : vector<16x144xf32>, vector<144x128xf32>, vector<16x128xf32> -> vector<16x128xf32>
    %302 = vector.broadcast %299 : vector<16x1xf32> to vector<16x128xf32>
    %303 = arith.addf %301, %302 : vector<16x128xf32>
    %304 = vector.extract_strided_slice %303 {offsets = [0, 0], sizes = [8, 128], strides = [1, 1]} : vector<16x128xf32> to vector<8x128xf32>
    %305 = vector.extract_strided_slice %303 {offsets = [8, 0], sizes = [8, 128], strides = [1, 1]} : vector<16x128xf32> to vector<8x128xf32>
    %cst_157 = arith.constant 0.000000e+00 : f32
    %306 = vector.broadcast %cst_157 : f32 to vector<8x128xf32>
    %307 = arith.maximumf %304, %306 : vector<8x128xf32>
    %cst_158 = arith.constant 0.000000e+00 : f32
    %308 = vector.broadcast %cst_158 : f32 to vector<8x128xf32>
    %309 = arith.maximumf %305, %308 : vector<8x128xf32>
    %310 = arith.subf %305, %309 : vector<8x128xf32>
    %311 = arith.addf %307, %310 : vector<8x128xf32>
    %312 = arith.subf %304, %307 : vector<8x128xf32>
    %313 = arith.addf %309, %312 : vector<8x128xf32>
    %314 = tpu.concatenate %311, %313 in 0 : vector<8x128xf32>, vector<8x128xf32> -> vector<16x128xf32>
    %c0_159 = arith.constant 0 : index
    %c0_160 = arith.constant 0 : index
    %315 = vector.load %arg5[%c0_159, %c0_160] : memref<16x128xf32, #tpu.memory_space<vmem>>, vector<16x128xf32>
    tpu.vector_store %arg5[%c0_159, %c0_160], %314 {strides = array<i32>} : memref<16x128xf32, #tpu.memory_space<vmem>>, vector<16x128xf32>,
    return
  }
}

</mosaic_0001>

<bundles_post_ra>
// kernel: ytmt_down_block.1
= control target key start
LH: loop header
LB: loop body
LE: loop exit
PB: predicated region body
PF: predicated region fallthrough
CT: control target
= control target key end

     0   :  { %10 = vsyncpa [#allocation3], 0  ;;  %s879_s0 = inlined_call_operand.vmem [shape: f32[2,4,8,128], index: 0, kind: input, shape index: {}]   ;;  %s880_s1 = inlined_call_operand.vmem [shape: f32[16,144], index: 1, kind: input, shape index: {}]   ;;  %s881_s2 = inlined_call_operand.vmem [shape: f32[2,8,5], index: 2, kind: input, shape index: {}]   ;;  %s882_s3 = inlined_call_operand.vmem [shape: f32[11,8,128], index: 3, kind: input, shape index: {}]   ;;  %s883_s4 = inlined_call_operand.vmem [shape: f32[8], index: 4, kind: input, shape index: {}]   ;;  %s884_s5 = inlined_call_operand.vmem [shape: f32[16,128], index: 5, kind: output, shape index: {}]  }
   0x1   :  { %s25_s20 = sshll.u32 %s883_s4, 4  ;;  %s26_s20 = int_to_ptr.vmem [resolvable:$true] %s25_s20 }
   0x2   :  { %s582_s21 = scalar_lea.vmem %s26_s20, 16  ;;  %p587_p1 = scmp.lt.s32.totalorder %s26_s20, %s26_s20 }
   0x3   :  { %p583_p0 = scmp.ne.s32.totalorder %s26_s20, %s582_s21  ;;  %p588_p2 = scmp.lt.s32.totalorder %s582_s21, %s582_s21 }
   0x5   :  { %p589_p3 = por %p588_p2, %p587_p1 }
   0x7   :  { %p590_p4 = pnand %p589_p3, %p583_p0 }
   0x9   :  { %593 = shalt.err (!%p590_p4)
}
   0xa   :  { %s596_s22 = smov [#allocation2]  }
   0xb   :  { %28 = dma.vmem_to_smem %s26_s20, 16, %s596_s22, [#allocation3]  }
   0xc   :  { %594 = dma.done.wait [#allocation3], 16  }
   0xd   :  { %595 = vsyncadd [#allocation3], 4294967280 }
   0xe   :  { %32 = sfence }
   0xf   :  { %v645_v0 = vld [vmem:[%s881_s2 + $0x8] sm:$0xff]  ;;  %v597_v1 = vmov 0   ;;  %v651_v2 = vld [vmem:[%s881_s2] sm:$0xff]  ;;  %v496_v5 = vld [vmem:[%s879_s0 + $0x30] sm:$0xff]  ;;  %s499_s16 = sld [smem:[#allocation2 + $0x4]]  ;;  %vm81_vm0 = vcmask 15368  }
  0x10   :  { %554 = vset.pattern.permute.xlu0 %v597_v1  ;;  %v494_v3 = vld [vmem:[%s879_s0 + $0x20] sm:$0xff]  ;;  %v495_v4 = vld [vmem:[%s879_s0 + $0x28] sm:$0xff]  ;;  %v497_v6 = vld [vmem:[%s879_s0 + $0x38] sm:$0xff]  ;;  %s500_s17 = sld [smem:[#allocation2 + $0x5]]  ;;  %s598_s26 = smov 1   ;;  %vm383_vm1 = vcmask 130048  }
  0x11   :  { %235 = vperm.xlu0 %554, %v645_v0   ;;  %v220_v7 = vmax.f32 %v494_v3, %v495_v4  ;;  %v225_v8 = vmax.f32 %v496_v5, %v497_v6  ;;  %v33_v9 = vld [vmem:[%s879_s0] sm:$0xff]  ;;  %v478_v10 = vld [vmem:[%s879_s0 + $0x8] sm:$0xff]  ;;  %v479_v11 = vld [vmem:[%s879_s0 + $0x10] sm:$0xff]  ;;  %s44_s18 = sld [smem:[#allocation2]]  ;;  %s599_s27 = smov 127   ;;  %vm189_vm2 = vcmask 1039360  }
  0x12   :  { %v480_v12 = vld [vmem:[%s879_s0 + $0x18] sm:$0xff]  ;;  %v36_v14 = vmax.f32 %v33_v9, %v478_v10  ;;  %s501_s19 = sld [smem:[#allocation2 + $0x6]]  ;;  %v681_v56 = vld [vmem:[%s882_s3 + $0x48] sm:$0xff]  ;;  %v690_v60 = vld [vmem:[%s882_s3 + $0x50] sm:$0xff]  ;;  %s602_s28 = smov 121   ;;  %vm197_vm3 = vcmask 990208  }
  0x13   :  { %v226_v13 = vmax.f32 %v220_v7, %v225_v8  ;;  %v41_v15 = vmax.f32 %v479_v11, %v480_v12  ;;  %s481_s0 = sld [smem:[#allocation2 + $0x1]]  ;;  %s603_s29 = smov 7   ;;  %vm178_vm4 = vcmask 7168   ;;  %vm170_vm5 = vcmask 56320  }
  0x14   :  { %s482_s20 = sld [smem:[#allocation2 + $0x2]]  ;;  %s604_s30 = smov 8   ;;  %vm162_vm6 = vcmask 64512   ;;  %vm154_vm7 = vcmask 72704   ;;  %vm213_vm8 = vcmask 973824   ;;  %vm205_vm9 = vcmask 982016  }
  0x15   :  { %50 = vperm.xlu0 %554, %v651_v2   ;;  %v42_v18 = vmax.f32 %v36_v14, %v41_v15  ;;  %v245_v29 = vstv %s499_s16  ;;  %s704_s4 = sld [smem:[#allocation2 + $0x7]]  ;;  %s605_s6 = smov 9  }
  0x16   :  { %v248_v34 = vstv %s500_s17  ;;  %s483_s25 = sld [smem:[#allocation2 + $0x3]]  ;;  %s606_s7 = smov 120  }
  0x17   :  { %v60_v35 = vstv %s44_s18  ;;  %s607_s8 = smov 119  }
  0x18   :  { %v250_v38 = vstv %s501_s19 }
  0x19   :  { %v63_v41 = vstv %s481_s0 }
  0x1a   :  { %v65_v44 = vstv %s482_s20 }
  0x8c   :  { %v236_v16 = vpop.permute.xlu0 %235 }
  0x8d   :  { %v238_v17 = vmul.f32 %v236_v16, %v226_v13 }
  0x8f   :  { %v239_v19 = vrot.slane %v238_v17, 4 }
  0x90   :  { %v51_v20 = vpop.permute.xlu0 %50 }
  0x91   :  { %v240_v21 = vadd.f32 %v239_v19, %v238_v17  ;;  %v53_v22 = vmul.f32 %v51_v20, %v42_v18 }
  0x93   :  { %v241_v23 = vrot.slane %v240_v21, 2  ;;  %v54_v24 = vrot.slane %v53_v22, 4 }
  0x95   :  { %v242_v25 = vadd.f32 %v241_v23, %v240_v21  ;;  %v55_v26 = vadd.f32 %v54_v24, %v53_v22 }
  0x97   :  { %v243_v27 = vrot.slane %v242_v25, 1  ;;  %v56_v28 = vrot.slane %v55_v26, 2 }
  0x99   :  { %v244_v30 = vadd.f32 %v243_v27, %v242_v25  ;;  %v57_v31 = vadd.f32 %v56_v28, %v55_v26 }
  0x9b   :  { %v246_v32 = vadd.f32 %v245_v29, %v244_v30  ;;  %v58_v33 = vrot.slane %v57_v31, 1 }
  0x9d   :  { %v247_v36 = vmax.f32 %v246_v32, 0.0  ;;  %v59_v37 = vadd.f32 %v58_v33, %v57_v31  ;;  %v271_v31 = vstv %s704_s4 }
  0x9f   :  { %v249_v39 = vmul.f32 %v248_v34, %v247_v36  ;;  %v61_v40 = vadd.f32 %v60_v35, %v59_v37 }
  0xa1   :  { %v251_v42 = vadd.f32 %v250_v38, %v249_v39  ;;  %v62_v43 = vmax.f32 %v61_v40, 0.0 }
  0xa3   :  { %v252_v45 = vsub.f32 0.0, %v251_v42  ;;  %v64_v46 = vmul.f32 %v63_v41, %v62_v43 }
  0xa5   :  { %v253_v47 = vmul.f32 1.442695, %v252_v45  ;;  %v66_v48 = vadd.f32 %v65_v44, %v64_v46 }
  0xa7   :  { %558 = vpow2.f32 %v253_v47  ;;  %v67_v49 = vsub.f32 0.0, %v66_v48  ;;  %v89_v48 = vstv %s483_s25 }
  0xa9   :  { %v68_v50 = vmul.f32 1.442695, %v67_v49 }
  0xab   :  { %560 = vpow2.f32 %v68_v50 }
  0xb4   :  { %v559_v51 = vpop.eup %558 }
  0xb5   :  { %v255_v52 = vadd.f32 1.0, %v559_v51 }
  0xb7   :  { %562 = vrcp.f32 %v255_v52 }
  0xb8   :  { %v561_v53 = vpop.eup %560 }
  0xb9   :  { %v70_v54 = vadd.f32 1.0, %v561_v53  ;;  %v600_v53 = vmov 2  }
  0xba   :  { %555 = vset.pattern.permute.xlu1 %v600_v53 }
  0xbb   :  { %564 = vrcp.f32 %v70_v54 }
  0xc4   :  { %v563_v55 = vpop.eup %562 }
  0xc5   :  { %v683_v57 = vmul.f32 %v563_v55, %v226_v13 }
  0xc7   :  { %v259_v58 = vmul.f32 %v681_v56, %v683_v57  ;;  %v295_v62 = vmul.f32 %v690_v60, %v683_v57 }
  0xc8   :  { %v565_v59 = vpop.eup %564 }
  0xc9   :  { %v692_v61 = vmul.f32 %v565_v59, %v42_v18  ;;  %260 = vadd.xlane.f32.xlu1 %v259_v58 }
  0xcb   :  { %v76_v63 = vmul.f32 %v681_v56, %v692_v61  ;;  %v115_v1 = vmul.f32 %v690_v60, %v692_v61 }
  0xcd   :  { %296 = vadd.xlane.f32.xlu1 %v295_v62  ;;  %77 = vadd.xlane.f32.xlu0 %v76_v63 }
  0xd1   :  { %116 = vadd.xlane.f32.xlu1 %v115_v1 }
 0x152   :  { %v261_v3 = vpop.xlane.xlu1 %260 }
 0x153   :  { %v262_v4 = vmul.f32 0.015625, %v261_v3 }
 0x155   :  { %v263_v5 = vmul.f32 %v645_v0, %v262_v4 }
 0x156   :  { %v297_v6 = vpop.xlane.xlu1 %296  ;;  %v78_v7 = vpop.xlane.xlu0 %77 }
 0x157   :  { %v264_v8 = vsel %vm81_vm0, %v263_v5, 0.0  ;;  %v298_v9 = vmul.f32 0.015625, %v297_v6  ;;  %v79_v10 = vmul.f32 0.015625, %v78_v7 }
 0x158   :  { %v265_v11 = vrot.slane %v264_v8, 4 }
 0x159   :  { %v299_v12 = vmul.f32 %v645_v0, %v298_v9  ;;  %v80_v13 = vmul.f32 %v79_v10, %v651_v2 }
 0x15a   :  { %v266_v14 = vadd.f32 %v265_v11, %v264_v8  ;;  %v117_v15 = vpop.xlane.xlu1 %116 }
 0x15b   :  { %v300_v16 = vsel %vm81_vm0, %v299_v12, 0.0  ;;  %v82_v17 = vsel %vm81_vm0, %v80_v13, 0.0  ;;  %v118_v18 = vmul.f32 0.015625, %v117_v15 }
 0x15c   :  { %v267_v19 = vrot.slane %v266_v14, 2  ;;  %v301_v20 = vrot.slane %v300_v16, 4  ;;  %v83_v21 = vrot.slane %v82_v17, 4 }
 0x15d   :  { %v119_v22 = vmul.f32 %v118_v18, %v651_v2 }
 0x15e   :  { %v268_v23 = vadd.f32 %v267_v19, %v266_v14  ;;  %v302_v24 = vadd.f32 %v301_v20, %v300_v16  ;;  %v84_v25 = vadd.f32 %v83_v21, %v82_v17 }
 0x15f   :  { %v120_v26 = vsel %vm81_vm0, %v119_v22, 0.0 }
 0x160   :  { %v303_v27 = vrot.slane %v302_v24, 2  ;;  %v85_v28 = vrot.slane %v84_v25, 2  ;;  %v121_v29 = vrot.slane %v120_v26, 4  ;;  %v269_v30 = vrot.slane %v268_v23, 1 }
 0x162   :  { %v304_v32 = vadd.f32 %v303_v27, %v302_v24  ;;  %v86_v33 = vadd.f32 %v85_v28, %v84_v25  ;;  %v122_v34 = vadd.f32 %v121_v29, %v120_v26  ;;  %v270_v35 = vadd.f32 %v269_v30, %v268_v23 }
 0x164   :  { %v123_v36 = vrot.slane %v122_v34, 2  ;;  %v272_v37 = vadd.f32 %v271_v31, %v270_v35  ;;  %v305_v38 = vrot.slane %v304_v32, 1  ;;  %v87_v42 = vrot.slane %v86_v33, 1 }
 0x166   :  { %v124_v39 = vadd.f32 %v123_v36, %v122_v34  ;;  %v273_v40 = vmax.f32 %v272_v37, 0.0  ;;  %v306_v41 = vadd.f32 %v305_v38, %v304_v32  ;;  %v88_v47 = vadd.f32 %v87_v42, %v86_v33  ;;  %v756_v42 = vld [vmem:[%s882_s3 + $0x30] sm:$0xff] }
 0x168   :  { %275 = vrot.lane.b32.xlu1 %v273_v40, %s598_s26  ;;  %v307_v43 = vadd.f32 %v306_v41, %v271_v31  ;;  %v125_v44 = vrot.slane %v124_v39, 1  ;;  %v90_v51 = vadd.f32 %v89_v48, %v88_v47  ;;  %v601_v31 = vmov 0.0   ;;  %v769_v47 = vld [vmem:[%s882_s3 + $0x20] sm:$0xff] }
 0x169   :  { %390 = vmatprep.subr.mxu0 %v601_v31  ;;  %505 = vmatprep.subr.mxu1 %v601_v31 }
 0x16a   :  { %v308_v45 = vmax.f32 %v307_v43, 0.0  ;;  %v126_v46 = vadd.f32 %v125_v44, %v124_v39  ;;  %v91_v52 = vmax.f32 %v90_v51, 0.0  ;;  %v775_v51 = vld [vmem:[%s882_s3 + $0x18] sm:$0xff] }
 0x16c   :  { %310 = vrot.lane.b32.xlu1 %v308_v45, %s598_s26  ;;  %v127_v49 = vadd.f32 %v126_v46, %v89_v48  ;;  %v761_v45 = vld [vmem:[%s882_s3 + $0x28] sm:$0xff] }
 0x16e   :  { %v128_v50 = vmax.f32 %v127_v49, 0.0 }
 0x170   :  { %279 = vrot.lane.b32.xlu1 %v645_v0, %s599_s27  ;;  %130 = vrot.lane.b32.xlu0 %v128_v50, %s598_s26 }
 0x174   :  { %93 = vrot.lane.b32.xlu1 %v91_v52, %s598_s26 }
 0x178   :  { %97 = vrot.lane.b32.xlu1 %v651_v2, %s599_s27 }
 0x1da   :  { %v276_v54 = vpop.permute.xlu1 %275 }
 0x1db   :  { %v278_v58 = vmul.f32 %v645_v0, %v276_v54  ;;  %v784_v54 = vld [vmem:[%s882_s3 + $0x10] sm:$0xff] }
 0x1de   :  { %v311_v55 = vpop.permute.xlu1 %310 }
 0x1df   :  { %v313_v59 = vmul.f32 %v645_v0, %v311_v55 }
 0x1e2   :  { %v280_v62 = vpop.permute.xlu1 %279  ;;  %v131_v5 = vpop.permute.xlu0 %130 }
 0x1e3   :  { %v282_v63 = vadd.f32 %v280_v62, %v278_v58  ;;  %v314_v1 = vadd.f32 %v313_v59, %v280_v62  ;;  %v133_v9 = vmul.f32 %v131_v5, %v651_v2 }
 0x1e5   :  { %v283_v3 = vsub.f32 0.0, %v282_v63  ;;  %v315_v4 = vsub.f32 0.0, %v314_v1  ;;  %v793_v63 = vld [vmem:[%s882_s3 + $0x8] sm:$0xff] }
 0x1e6   :  { %v94_v6 = vpop.permute.xlu1 %93 }
 0x1e7   :  { %v284_v7 = vmul.f32 1.442695, %v283_v3  ;;  %v316_v8 = vmul.f32 1.442695, %v315_v4  ;;  %v96_v10 = vmul.f32 %v94_v6, %v651_v2  ;;  %v802_v4 = vld [vmem:[%s882_s3] sm:$0xff] }
 0x1e9   :  { %566 = vpow2.f32 %v284_v7 }
 0x1ea   :  { %568 = vpow2.f32 %v316_v8  ;;  %v98_v11 = vpop.permute.xlu1 %97 }
 0x1eb   :  { %v100_v12 = vadd.f32 %v98_v11, %v96_v10  ;;  %v134_v13 = vadd.f32 %v133_v9, %v98_v11  ;;  %v811_v9 = vld [vmem:[%s882_s3 + $0x40] sm:$0xff] }
 0x1ed   :  { %v101_v14 = vsub.f32 0.0, %v100_v12  ;;  %v135_v15 = vsub.f32 0.0, %v134_v13  ;;  %v820_v12 = vld [vmem:[%s882_s3 + $0x38] sm:$0xff] }
 0x1ef   :  { %v102_v16 = vmul.f32 1.442695, %v101_v14  ;;  %v136_v17 = vmul.f32 1.442695, %v135_v15 }
 0x1f1   :  { %570 = vpow2.f32 %v102_v16 }
 0x1f2   :  { %572 = vpow2.f32 %v136_v17 }
 0x1f6   :  { %v567_v18 = vpop.eup %566 }
 0x1f7   :  { %v569_v19 = vpop.eup %568  ;;  %v286_v20 = vadd.f32 1.0, %v567_v18 }
 0x1f8   :  { %v318_v21 = vadd.f32 1.0, %v569_v19 }
 0x1f9   :  { %574 = vrcp.f32 %v286_v20 }
 0x1fa   :  { %576 = vrcp.f32 %v318_v21 }
 0x1fe   :  { %v571_v22 = vpop.eup %570 }
 0x1ff   :  { %v573_v23 = vpop.eup %572  ;;  %v104_v24 = vadd.f32 1.0, %v571_v22 }
 0x200   :  { %v138_v25 = vadd.f32 1.0, %v573_v23 }
 0x201   :  { %578 = vrcp.f32 %v104_v24 }
 0x202   :  { %580 = vrcp.f32 %v138_v25 }
 0x206   :  { %v575_v26 = vpop.eup %574 }
 0x207   :  { %291 = vperm.xlu1 %555, %v575_v26   ;;  %v577_v27 = vpop.eup %576 }
 0x20b   :  { %323 = vperm.xlu1 %555, %v577_v27  }
 0x20e   :  { %v579_v28 = vpop.eup %578 }
 0x20f   :  { %109 = vperm.xlu1 %555, %v579_v28   ;;  %v581_v29 = vpop.eup %580 }
 0x213   :  { %143 = vperm.xlu1 %555, %v581_v29  }
 0x282   :  { %v292_v30 = vpop.permute.xlu1 %291 }
 0x283   :  { %v294_v33 = vmul.f32 %v681_v56, %v292_v30 }
 0x286   :  { %v324_v32 = vpop.permute.xlu1 %323 }
 0x287   :  { %v326_v34 = vmul.f32 %v690_v60, %v324_v32 }
 0x289   :  { %v327_v35 = vadd.f32 %v326_v34, %v294_v33 }
 0x28a   :  { %v110_v36 = vpop.permute.xlu1 %109 }
 0x28b   :  { %v328_v37 = vmul.f32 %v327_v35, %v683_v57  ;;  %v112_v40 = vmul.f32 %v681_v56, %v110_v36  ;;  %v372_v56 = vld [vmem:[%s880_s1 + $0x8] sm:$0xff] }
 0x28c   :  { %503 = vmatprep.mubr.msk.f32.mxu0 %vm383_vm1, %v372_v56  ;;  %v373_v56 = vld [vmem:[%s880_s1 + $0x10] sm:$0xff] }
 0x28d   :  { %356 = vrot.lane.b32.xlu0 %v328_v37, %s602_s28  ;;  %351 = vrot.lane.b32.xlu1 %v328_v37, %s599_s27  ;;  %v350_v53 = vmul.f32 %v769_v47, %v328_v37 }
 0x28e   :  { %v144_v38 = vpop.permute.xlu1 %143 }
 0x28f   :  { %v146_v39 = vmul.f32 %v690_v60, %v144_v38  ;;  %v374_v60 = vld [vmem:[%s880_s1 + $0x18] sm:$0xff] }
 0x290   :  { %504 = vmatprep.mubr.msk.f32.mxu1 %vm383_vm1, %v374_v60 }
 0x291   :  { %345 = vrot.lane.b32.xlu0 %v328_v37, %s598_s26  ;;  %340 = vrot.lane.b32.xlu1 %v328_v37, %s603_s29  ;;  %v147_v41 = vadd.f32 %v146_v39, %v112_v40 }
 0x293   :  { %v733_v57 = vmul.f32 %v147_v41, %v692_v61  ;;  %v608_v61 = vmov 4  }
 0x294   :  { %556 = vset.pattern.permute.xlu0 %v608_v61  ;;  %557 = vset.pattern.permute.xlu1 %v608_v61 }
 0x295   :  { %335 = vrot.lane.b32.xlu0 %v328_v37, %s604_s30  ;;  %330 = vrot.lane.b32.xlu1 %v328_v37, %s605_s6  ;;  %v183_v27 = vmul.f32 %v769_v47, %v733_v57 }
 0x299   :  { %202 = vrot.lane.b32.xlu1 %v733_v57, %s606_s7  ;;  %210 = vrot.lane.b32.xlu0 %v733_v57, %s607_s8 }
 0x29d   :  { %186 = vrot.lane.b32.xlu1 %v733_v57, %s599_s27  ;;  %194 = vrot.lane.b32.xlu0 %v733_v57, %s602_s28 }
 0x2a1   :  { %167 = vrot.lane.b32.xlu1 %v733_v57, %s603_s29  ;;  %175 = vrot.lane.b32.xlu0 %v733_v57, %s598_s26 }
 0x2a5   :  { %151 = vrot.lane.b32.xlu1 %v733_v57, %s605_s6  ;;  %159 = vrot.lane.b32.xlu0 %v733_v57, %s604_s30  ;;  %v371_v57 = vld [vmem:[%s880_s1] sm:$0xff] }
 0x2a9   :  { %361 = vrot.lane.b32.xlu1 %v328_v37, %s606_s7  ;;  %366 = vrot.lane.b32.xlu0 %v328_v37, %s607_s8 }
 0x2ad   :  { %380 = vperm.xlu1 %557, %v645_v0   ;;  %376 = vperm.xlu0 %556, %v651_v2  }
 0x2ff   :  { %v352_v43 = vpop.permute.xlu1 %351  ;;  %v357_v44 = vpop.permute.xlu0 %356 }
 0x300   :  { %v354_v46 = vsel %vm189_vm2, %v352_v43, 0.0  ;;  %v359_v0 = vsel %vm197_vm3, %v357_v44, 0.0 }
 0x301   :  { %v360_v2 = vmul.f32 %v756_v42, %v359_v0  ;;  %v355_v48 = vmul.f32 %v761_v45, %v354_v46 }
 0x303   :  { %v341_v49 = vpop.permute.xlu1 %340  ;;  %391 = vmatpush1.msra.mxu0 %v360_v2  ;;  %523 = vmatpush1.msra.mxu1 %v360_v2  ;;  %v346_v50 = vpop.permute.xlu0 %345 }
 0x304   :  { %v348_v52 = vsel %vm178_vm4, 0.0, %v346_v50  ;;  %392 = vmatprep.subr.mxu0 %v601_v31  ;;  %506 = vmatprep.subr.mxu1 %v601_v31  ;;  %v343_v55 = vsel %vm170_vm5, 0.0, %v341_v49 }
 0x305   :  { %393 = vmatpush1.msra.mxu0 %v355_v48  ;;  %524 = vmatpush1.msra.mxu1 %v355_v48  ;;  %v349_v58 = vmul.f32 %v775_v51, %v348_v52  ;;  %v344_v3 = vmul.f32 %v784_v54, %v343_v55 }
 0x306   :  { %394 = vmatprep.subr.mxu0 %v601_v31  ;;  %507 = vmatprep.subr.mxu1 %v601_v31 }
 0x307   :  { %v331_v59 = vpop.permute.xlu1 %330  ;;  %395 = vmatpush1.msra.mxu0 %v350_v53  ;;  %525 = vmatpush1.msra.mxu1 %v350_v53  ;;  %v336_v62 = vpop.permute.xlu0 %335 }
 0x308   :  { %v338_v1 = vsel %vm162_vm6, 0.0, %v336_v62  ;;  %396 = vmatprep.subr.mxu0 %v601_v31  ;;  %508 = vmatprep.subr.mxu1 %v601_v31  ;;  %v333_v5 = vsel %vm154_vm7, 0.0, %v331_v59 }
 0x309   :  { %397 = vmatpush1.msra.mxu0 %v349_v58  ;;  %526 = vmatpush1.msra.mxu1 %v349_v58  ;;  %v339_v6 = vmul.f32 %v793_v63, %v338_v1  ;;  %v334_v11 = vmul.f32 %v333_v5, %v802_v4 }
 0x30a   :  { %398 = vmatprep.subr.mxu0 %v601_v31  ;;  %509 = vmatprep.subr.mxu1 %v601_v31 }
 0x30b   :  { %v203_v7 = vpop.permute.xlu1 %202  ;;  %399 = vmatpush1.msra.mxu0 %v344_v3  ;;  %527 = vmatpush1.msra.mxu1 %v344_v3  ;;  %v211_v8 = vpop.permute.xlu0 %210 }
 0x30c   :  { %v214_v10 = vsel %vm213_vm8, %v211_v8, 0.0  ;;  %400 = vmatprep.subr.mxu0 %v601_v31  ;;  %510 = vmatprep.subr.mxu1 %v601_v31  ;;  %v206_v13 = vsel %vm205_vm9, %v203_v7, 0.0 }
 0x30d   :  { %401 = vmatpush1.msra.mxu0 %v339_v6  ;;  %528 = vmatpush1.msra.mxu1 %v339_v6  ;;  %v215_v14 = vmul.f32 %v811_v9, %v214_v10  ;;  %v207_v18 = vmul.f32 %v820_v12, %v206_v13 }
 0x30e   :  { %402 = vmatprep.subr.mxu0 %v601_v31  ;;  %511 = vmatprep.subr.mxu1 %v601_v31 }
 0x30f   :  { %v187_v15 = vpop.permute.xlu1 %186  ;;  %403 = vmatpush1.msra.mxu0 %v334_v11  ;;  %529 = vmatpush1.msra.mxu1 %v334_v11  ;;  %v195_v16 = vpop.permute.xlu0 %194 }
 0x310   :  { %v198_v17 = vsel %vm197_vm3, %v195_v16, 0.0  ;;  %404 = vmatprep.subr.mxu0 %v601_v31  ;;  %512 = vmatprep.subr.mxu1 %v601_v31  ;;  %v190_v19 = vsel %vm189_vm2, %v187_v15, 0.0 }
 0x311   :  { %405 = vmatpush1.msra.mxu0 %v215_v14  ;;  %530 = vmatpush1.msra.mxu1 %v215_v14  ;;  %v199_v20 = vmul.f32 %v756_v42, %v198_v17  ;;  %v191_v23 = vmul.f32 %v761_v45, %v190_v19 }
 0x312   :  { %406 = vmatprep.subr.mxu0 %v601_v31  ;;  %513 = vmatprep.subr.mxu1 %v601_v31 }
 0x313   :  { %v168_v21 = vpop.permute.xlu1 %167  ;;  %407 = vmatpush1.msra.mxu0 %v207_v18  ;;  %531 = vmatpush1.msra.mxu1 %v207_v18  ;;  %v176_v22 = vpop.permute.xlu0 %175 }
 0x314   :  { %408 = vmatprep.subr.mxu0 %v601_v31  ;;  %514 = vmatprep.subr.mxu1 %v601_v31  ;;  %v179_v24 = vsel %vm178_vm4, 0.0, %v176_v22  ;;  %v171_v28 = vsel %vm170_vm5, 0.0, %v168_v21 }
 0x315   :  { %409 = vmatpush1.msra.mxu0 %v199_v20  ;;  %532 = vmatpush1.msra.mxu1 %v199_v20  ;;  %v180_v29 = vmul.f32 %v775_v51, %v179_v24  ;;  %v172_v32 = vmul.f32 %v784_v54, %v171_v28 }
 0x316   :  { %410 = vmatprep.subr.mxu0 %v601_v31  ;;  %515 = vmatprep.subr.mxu1 %v601_v31 }
 0x317   :  { %v152_v25 = vpop.permute.xlu1 %151  ;;  %411 = vmatpush1.msra.mxu0 %v191_v23  ;;  %533 = vmatpush1.msra.mxu1 %v191_v23  ;;  %v160_v26 = vpop.permute.xlu0 %159 }
 0x318   :  { %412 = vmatprep.subr.mxu0 %v601_v31  ;;  %516 = vmatprep.subr.mxu1 %v601_v31  ;;  %v163_v30 = vsel %vm162_vm6, 0.0, %v160_v26  ;;  %v155_v34 = vsel %vm154_vm7, 0.0, %v152_v25 }
 0x319   :  { %413 = vmatpush1.msra.mxu0 %v183_v27  ;;  %534 = vmatpush1.msra.mxu1 %v183_v27  ;;  %v164_v35 = vmul.f32 %v793_v63, %v163_v30  ;;  %v156_v38 = vmul.f32 %v155_v34, %v802_v4 }
 0x31a   :  { %414 = vmatprep.subr.mxu0 %v601_v31  ;;  %517 = vmatprep.subr.mxu1 %v601_v31 }
 0x31b   :  { %415 = vmatpush1.msra.mxu0 %v180_v29  ;;  %535 = vmatpush1.msra.mxu1 %v180_v29  ;;  %v367_v33 = vpop.permute.xlu0 %366  ;;  %v362_v36 = vpop.permute.xlu1 %361 }
 0x31c   :  { %416 = vmatprep.subr.mxu0 %v601_v31  ;;  %518 = vmatprep.subr.mxu1 %v601_v31  ;;  %v369_v37 = vsel %vm213_vm8, %v367_v33, 0.0  ;;  %v364_v39 = vsel %vm205_vm9, %v362_v36, 0.0 }
 0x31d   :  { %417 = vmatpush1.msra.mxu0 %v172_v32  ;;  %536 = vmatpush1.msra.mxu1 %v172_v32  ;;  %v370_v40 = vmul.f32 %v811_v9, %v369_v37  ;;  %v365_v41 = vmul.f32 %v820_v12, %v364_v39 }
 0x31e   :  { %418 = vmatprep.subr.mxu0 %v601_v31  ;;  %519 = vmatprep.subr.mxu1 %v601_v31 }
 0x31f   :  { %419 = vmatpush1.msra.mxu0 %v164_v35  ;;  %537 = vmatpush1.msra.mxu1 %v164_v35 }
 0x320   :  { %420 = vmatprep.subr.mxu0 %v601_v31  ;;  %520 = vmatprep.subr.mxu1 %v601_v31 }
 0x321   :  { %421 = vmatpush1.msra.mxu0 %v156_v38  ;;  %538 = vmatpush1.msra.mxu1 %v156_v38 }
 0x322   :  { %450 = vmatprep.subr.mxu0 %v601_v31  ;;  %521 = vmatprep.subr.mxu1 %v601_v31 }
 0x323   :  { %451 = vmatpush2.msra.mxu0 %v370_v40  ;;  %539 = vmatpush2.msra.mxu1 %v370_v40 }
 0x324   :  { %452 = vmatprep.subr.mxu0 %v601_v31  ;;  %522 = vmatprep.subr.mxu1 %v601_v31 }
 0x325   :  { %453 = vmatpush2.msra.mxu0 %v365_v41  ;;  %540 = vmatpush2.msra.mxu1 %v365_v41 }
 0x326   :  { %455 = vmatmul.mubr.f32.vlgmr.msra.gmra.mxu0 %v371_v57  ;;  %460 = vmatmul.mubr.f32.vlgmr.msra.gmra.mxu1 %v373_v56 }
 0x328   :  { %v381_v60 = vpop.permute.xlu1 %380  ;;  %v377_v61 = vpop.permute.xlu0 %376 }
 0x3e6   :  { %v456_v42 = vpop.f32.mrf.mxu0  ;;  %v461_v43 = vpop.f32.mrf.mxu1 }
 0x3e7   :  { %v462_v44 = vadd.f32 %v461_v43, %v381_v60  ;;  %v457_v45 = vadd.f32 %v456_v42, %v377_v61 }
 0x3e8   :  { %v458_v46 = vpop.f32.mrf.mxu0  ;;  %v463_v0 = vpop.f32.mrf.mxu1 }
 0x3e9   :  { %v466_v2 = vmax.f32 %v462_v44, 0.0  ;;  %v465_v47 = vmax.f32 %v457_v45, 0.0 }
 0x3eb   :  { %v467_v48 = vsub.f32 %v462_v44, %v466_v2  ;;  %v469_v49 = vsub.f32 %v457_v45, %v465_v47 }
 0x3ed   :  { %v468_v50 = vadd.f32 %v467_v48, %v465_v47  ;;  %v470_v51 = vadd.f32 %v469_v49, %v466_v2 }
 0x3ef   :  { %471 = vst [vmem:[%s884_s5] sm:$0xff] %v468_v50  ;;  %472 = vst [vmem:[%s884_s5 + $0x8] sm:$0xff] %v470_v51 }
 0x3f0   :  { %477 = vsyncpa [#allocation3], 1 }

</bundles_post_ra>
